<compile_context>
chip_gen: v7x
topology: tpu7x:2x2x1
jax: 0.10.0
libtpu: 0.0.40
codegen_flags: <defaults>
</compile_context>

<pallas_src>
import jax
import jax.numpy as jnp
from jax.experimental import pallas as pl
from jax.experimental.pallas import tpu as pltpu


def _make_kernel(latent_dim, output_dim, bf16_matmul=False):
    """Build a fused 3-layer MLP kernel specialized on static feature dims."""

    def kernel(z_ref, w1_ref, b1_ref, w2_ref, b2_ref, w3_ref, b3_ref, out_ref):
        z = z_ref[...]

        # ---- Layer 1: Linear(latent, hidden) + LeakyReLU(0.2) ----
        if latent_dim == 1:
            # (tb, 1) * (1, hidden) broadcast multiply — pure VPU, no MXU round trip.
            h = z * w1_ref[...] + b1_ref[...]
        else:
            h = jnp.dot(z, w1_ref[...], preferred_element_type=jnp.float32) + b1_ref[...]
        h = jnp.where(h >= 0, h, 0.2 * h)

        # ---- Layer 2: Linear(hidden, hidden) + LeakyReLU(0.2) — the only real matmul ----
        if bf16_matmul:
            h2 = jnp.dot(h.astype(jnp.bfloat16), w2_ref[...].astype(jnp.bfloat16),
                         preferred_element_type=jnp.float32)
        else:
            h2 = jnp.dot(h, w2_ref[...], preferred_element_type=jnp.float32)
        h = h2 + b2_ref[...]
        h = jnp.where(h >= 0, h, 0.2 * h)

        # ---- Layer 3: Linear(hidden, output) ----
        if output_dim == 1:
            # w3 provided as a lane-dense (1, hidden) row: VPU mul + XLU lane reduce.
            out = jnp.sum(h * w3_ref[...], axis=-1, keepdims=True) + b3_ref[...]
        else:
            out = jnp.dot(h, w3_ref[...], preferred_element_type=jnp.float32) + b3_ref[...]

        out_ref[...] = out.astype(out_ref.dtype)

    return kernel


def gan1_generator_forward(z, params, *, max_tb=512, bf16_matmul=False):
    """z: (B, latent_dim) float32 -> (B, output_dim) float32."""
    w1, b1, w2, b2, w3, b3 = params
    B, latent_dim = z.shape
    hidden_dim = w2.shape[0]
    output_dim = w3.shape[1]

    # Layer-3 weight as a lane-dense (1, hidden) row when output_dim == 1.
    if output_dim == 1:
        w3_arg = w3.reshape(1, hidden_dim)
        w3_block = (1, hidden_dim)
    else:
        w3_arg = w3
        w3_block = (hidden_dim, output_dim)

    # Batch tiling: whole batch in one block when it is small (no grid overhead);
    # otherwise large tiles (multiple of 8, MXU-filling) with zero-padding.
    if B <= max_tb:
        tb = B
        B_pad = B
        z_pad = z
    else:
        tb = max_tb
        B_pad = pl.cdiv(B, tb) * tb
        z_pad = jnp.pad(z, ((0, B_pad - B), (0, 0))) if B_pad != B else z

    grid = (B_pad // tb,)
    kernel = _make_kernel(latent_dim, output_dim, bf16_matmul)

    out = pl.pallas_call(
        kernel,
        out_shape=jax.ShapeDtypeStruct((B_pad, output_dim), jnp.float32),
        grid_spec=pltpu.PrefetchScalarGridSpec(
            num_scalar_prefetch=0,
            grid=grid,
            in_specs=[
                pl.BlockSpec((tb, latent_dim), lambda i: (i, 0)),          # z tile
                pl.BlockSpec((latent_dim, hidden_dim), lambda i: (0, 0)),  # w1 (resident)
                pl.BlockSpec((1, hidden_dim), lambda i: (0, 0)),           # b1
                pl.BlockSpec((hidden_dim, hidden_dim), lambda i: (0, 0)),  # w2
                pl.BlockSpec((1, hidden_dim), lambda i: (0, 0)),           # b2
                pl.BlockSpec(w3_block, lambda i: (0, 0)),                  # w3 (row if out=1)
                pl.BlockSpec((1, output_dim), lambda i: (0, 0)),           # b3
            ],
            out_specs=pl.BlockSpec((tb, output_dim), lambda i: (i, 0)),
        ),
        compiler_params=pltpu.CompilerParams(
            dimension_semantics=("parallel",)),
    )(z_pad, w1, b1, w2, b2, w3_arg, b3)

    return out[:B] if B_pad != B else out


def init_params(key, latent_dim=1, hidden_dim=128, output_dim=1):
    """Deterministic init mimicking PyTorch nn.Linear default (U[-1/sqrt(fan_in), +])."""
    ks = jax.random.split(key, 6)

    def lin(kw, kb, fan_in, fan_out):
        bound = 1.0 / jnp.sqrt(fan_in)
        # stored as (in, out): transpose of PyTorch's (out, in) weight
        w = jax.random.uniform(kw, (fan_in, fan_out), jnp.float32, -bound, bound)
        b = jax.random.uniform(kb, (1, fan_out), jnp.float32, -bound, bound)
        return w, b

    w1, b1 = lin(ks[0], ks[1], latent_dim, hidden_dim)
    w2, b2 = lin(ks[2], ks[3], hidden_dim, hidden_dim)
    w3, b3 = lin(ks[4], ks[5], hidden_dim, output_dim)
    return (w1, b1, w2, b2, w3, b3)


def reference_forward(z, params):
    w1, b1, w2, b2, w3, b3 = params
    h = z @ w1 + b1
    h = jnp.where(h >= 0, h, 0.2 * h)
    h = h @ w2 + b2
    h = jnp.where(h >= 0, h, 0.2 * h)
    return h @ w3 + b3


if __name__ == "__main__":
    latent_dim, hidden_dim, output_dim = 1, 128, 1

    key = jax.random.PRNGKey(0)
    kp, kz1, kz2 = jax.random.split(key, 3)
    params = init_params(kp, latent_dim, hidden_dim, output_dim)

    # Small batch: whole batch in one block, single grid step.
    z_small = jax.random.normal(kz1, (16, latent_dim), jnp.float32)
    out_small = jax.block_until_ready(gan1_generator_forward(z_small, params))
    ref_small = reference_forward(z_small, params)
    assert out_small.shape == (16, output_dim)
    assert jnp.allclose(out_small, ref_small, atol=1e-4, rtol=1e-4), "small-batch mismatch"

    # Larger, non-multiple batch: exercises padding + multi-tile parallel grid.
    z_big = jax.random.normal(kz2, (600, latent_dim), jnp.float32)
    out_big = jax.block_until_ready(gan1_generator_forward(z_big, params, max_tb=512))
    ref_big = reference_forward(z_big, params)
    assert out_big.shape == (600, output_dim)
    assert jnp.allclose(out_big, ref_big, atol=1e-4, rtol=1e-4), "big-batch mismatch"

    print("KERNEL_OK")
</pallas_src>

<mosaic_0001>
module attributes {stable_mosaic.version = 11 : i64} {
  func.func @kernel(%arg0: i32, %arg1: memref<16x1xf32, #tpu.memory_space<vmem>>, %arg2: memref<1x128xf32, #tpu.memory_space<vmem>>, %arg3: memref<1x128xf32, #tpu.memory_space<vmem>>, %arg4: memref<128x128xf32, #tpu.memory_space<vmem>>, %arg5: memref<1x128xf32, #tpu.memory_space<vmem>>, %arg6: memref<1x128xf32, #tpu.memory_space<vmem>>, %arg7: memref<1x1xf32, #tpu.memory_space<vmem>>, %arg8: memref<16x1xf32, #tpu.memory_space<vmem>>) attributes {dimension_semantics = [#tpu.dimension_semantics<parallel>], iteration_bounds = array<i64: 1>, scalar_prefetch = 0 : i64, scratch_operands = 0 : i64, tpu.core_type = #tpu.core_type<tc>, window_params = [{transform_indices = @transform_0, window_bounds = array<i64: 16, 1>}, {pipeline_mode = #tpu.pipeline_mode<synchronous>, transform_indices = @transform_1, window_bounds = array<i64: 1, 128>}, {pipeline_mode = #tpu.pipeline_mode<synchronous>, transform_indices = @transform_2, window_bounds = array<i64: 1, 128>}, {pipeline_mode = #tpu.pipeline_mode<synchronous>, transform_indices = @transform_3, window_bounds = array<i64: 128, 128>}, {pipeline_mode = #tpu.pipeline_mode<synchronous>, transform_indices = @transform_4, window_bounds = array<i64: 1, 128>}, {pipeline_mode = #tpu.pipeline_mode<synchronous>, transform_indices = @transform_5, window_bounds = array<i64: 1, 128>}, {pipeline_mode = #tpu.pipeline_mode<synchronous>, transform_indices = @transform_6, window_bounds = array<i64: 1, 1>}, {transform_indices = @transform_7, window_bounds = array<i64: 16, 1>}]} {
    %c0 = arith.constant 0 : index
    %c0_0 = arith.constant 0 : index
    %0 = vector.load %arg1[%c0, %c0_0] : memref<16x1xf32, #tpu.memory_space<vmem>>, vector<16x1xf32>
    %c0_1 = arith.constant 0 : index
    %c0_2 = arith.constant 0 : index
    %1 = vector.load %arg2[%c0_1, %c0_2] : memref<1x128xf32, #tpu.memory_space<vmem>>, vector<1x128xf32>
    %2 = vector.broadcast %0 : vector<16x1xf32> to vector<16x128xf32>
    %3 = vector.broadcast %1 : vector<1x128xf32> to vector<16x128xf32>
    %4 = arith.mulf %2, %3 : vector<16x128xf32>
    %c0_3 = arith.constant 0 : index
    %c0_4 = arith.constant 0 : index
    %5 = vector.load %arg3[%c0_3, %c0_4] : memref<1x128xf32, #tpu.memory_space<vmem>>, vector<1x128xf32>
    %6 = vector.broadcast %5 : vector<1x128xf32> to vector<16x128xf32>
    %7 = arith.addf %4, %6 : vector<16x128xf32>
    %cst = arith.constant 0.000000e+00 : f32
    %8 = vector.broadcast %cst : f32 to vector<16x128xf32>
    %9 = arith.cmpf oge, %7, %8 : vector<16x128xf32>
    %cst_5 = arith.constant 2.000000e-01 : f32
    %10 = vector.broadcast %cst_5 : f32 to vector<16x128xf32>
    %11 = arith.mulf %10, %7 : vector<16x128xf32>
    %12 = arith.select %9, %7, %11 : vector<16x128xi1>, vector<16x128xf32>
    %c0_6 = arith.constant 0 : index
    %c0_7 = arith.constant 0 : index
    %13 = vector.load %arg4[%c0_6, %c0_7] : memref<128x128xf32, #tpu.memory_space<vmem>>, vector<128x128xf32>
    %cst_8 = arith.constant dense<0.000000e+00> : vector<16x128xf32>
    %14 = tpu.matmul %12, %13, %cst_8 {dimension_numbers = #tpu.dot_dimension_numbers<[1], [0], [0], [1], [0, 0, 1, 1], [], []>} : vector<16x128xf32>, vector<128x128xf32>, vector<16x128xf32> -> vector<16x128xf32>
    %c0_9 = arith.constant 0 : index
    %c0_10 = arith.constant 0 : index
    %15 = vector.load %arg5[%c0_9, %c0_10] : memref<1x128xf32, #tpu.memory_space<vmem>>, vector<1x128xf32>
    %16 = vector.broadcast %15 : vector<1x128xf32> to vector<16x128xf32>
    %17 = arith.addf %14, %16 : vector<16x128xf32>
    %cst_11 = arith.constant 0.000000e+00 : f32
    %18 = vector.broadcast %cst_11 : f32 to vector<16x128xf32>
    %19 = arith.cmpf oge, %17, %18 : vector<16x128xf32>
    %cst_12 = arith.constant 2.000000e-01 : f32
    %20 = vector.broadcast %cst_12 : f32 to vector<16x128xf32>
    %21 = arith.mulf %20, %17 : vector<16x128xf32>
    %22 = arith.select %19, %17, %21 : vector<16x128xi1>, vector<16x128xf32>
    %c0_13 = arith.constant 0 : index
    %c0_14 = arith.constant 0 : index
    %23 = vector.load %arg6[%c0_13, %c0_14] : memref<1x128xf32, #tpu.memory_space<vmem>>, vector<1x128xf32>
    %24 = vector.broadcast %23 : vector<1x128xf32> to vector<16x128xf32>
    %25 = arith.mulf %22, %24 : vector<16x128xf32>
    %cst_15 = arith.constant dense<0.000000e+00> : vector<16xf32>
    %26 = vector.multi_reduction <add>, %25, %cst_15 [1] : vector<16x128xf32> to vector<16xf32>
    %27 = vector.shape_cast %26 : vector<16xf32> to vector<16x1xf32>
    %c0_16 = arith.constant 0 : index
    %c0_17 = arith.constant 0 : index
    %28 = vector.load %arg7[%c0_16, %c0_17] : memref<1x1xf32, #tpu.memory_space<vmem>>, vector<1x1xf32>
    %29 = vector.broadcast %28 : vector<1x1xf32> to vector<16x1xf32>
    %30 = arith.addf %27, %29 : vector<16x1xf32>
    %c0_18 = arith.constant 0 : index
    %c0_19 = arith.constant 0 : index
    %31 = vector.load %arg8[%c0_18, %c0_19] : memref<16x1xf32, #tpu.memory_space<vmem>>, vector<16x1xf32>
    tpu.vector_store %arg8[%c0_18, %c0_19], %30 {strides = array<i32>} : memref<16x1xf32, #tpu.memory_space<vmem>>, vector<16x1xf32>,
    return
  }
  func.func @transform_0(%arg0: i32) -> (i32, i32) {
    %c0_i32 = arith.constant 0 : i32
    %c0_i32_0 = arith.constant 0 : i32
    return %arg0, %c0_i32 : i32, i32
  }
  func.func @transform_1(%arg0: i32) -> (i32, i32) {
    %c0_i32 = arith.constant 0 : i32
    %c0_i32_0 = arith.constant 0 : i32
    %c0_i32_1 = arith.constant 0 : i32
    return %c0_i32, %c0_i32_0 : i32, i32
  }
  func.func @transform_2(%arg0: i32) -> (i32, i32) {
    %c0_i32 = arith.constant 0 : i32
    %c0_i32_0 = arith.constant 0 : i32
    %c0_i32_1 = arith.constant 0 : i32
    return %c0_i32, %c0_i32_0 : i32, i32
  }
  func.func @transform_3(%arg0: i32) -> (i32, i32) {
    %c0_i32 = arith.constant 0 : i32
    %c0_i32_0 = arith.constant 0 : i32
    %c0_i32_1 = arith.constant 0 : i32
    return %c0_i32, %c0_i32_0 : i32, i32
  }
  func.func @transform_4(%arg0: i32) -> (i32, i32) {
    %c0_i32 = arith.constant 0 : i32
    %c0_i32_0 = arith.constant 0 : i32
    %c0_i32_1 = arith.constant 0 : i32
    return %c0_i32, %c0_i32_0 : i32, i32
  }
  func.func @transform_5(%arg0: i32) -> (i32, i32) {
    %c0_i32 = arith.constant 0 : i32
    %c0_i32_0 = arith.constant 0 : i32
    %c0_i32_1 = arith.constant 0 : i32
    return %c0_i32, %c0_i32_0 : i32, i32
  }
  func.func @transform_6(%arg0: i32) -> (i32, i32) {
    %c0_i32 = arith.constant 0 : i32
    %c0_i32_0 = arith.constant 0 : i32
    %c0_i32_1 = arith.constant 0 : i32
    return %c0_i32, %c0_i32_0 : i32, i32
  }
  func.func @transform_7(%arg0: i32) -> (i32, i32) {
    %c0_i32 = arith.constant 0 : i32
    %c0_i32_0 = arith.constant 0 : i32
    return %arg0, %c0_i32 : i32, i32
  }
}

</mosaic_0001>

<bundles_post_ra>
// kernel: tpu_custom_call.1
= control target key start
LH: loop header
LB: loop body
LE: loop exit
PB: predicated region body
PF: predicated region fallthrough
CT: control target
= control target key end

     0   :  { %s414_s0 = inlined_call_operand.vmem [shape: f32[16,1], index: 0, kind: input, shape index: {}]   ;;  %s415_s1 = inlined_call_operand.vmem [shape: f32[1,128], index: 1, kind: input, shape index: {}]   ;;  %s416_s2 = inlined_call_operand.vmem [shape: f32[1,128], index: 2, kind: input, shape index: {}]   ;;  %s417_s3 = inlined_call_operand.hbm [shape: f32[128,128], index: 3, kind: input, shape index: {}]   ;;  %s418_s4 = inlined_call_operand.vmem [shape: f32[1,128], index: 4, kind: input, shape index: {}]   ;;  %s419_s5 = inlined_call_operand.vmem [shape: f32[1,128], index: 5, kind: input, shape index: {}]   ;;  %s420_s6 = inlined_call_operand.<no memory space> [shape: f32[1,1], index: 6, kind: input, shape index: {}]   ;;  %s421_s7 = inlined_call_operand.vmem [shape: f32[16,1], index: 7, kind: output, shape index: {}]  }
   0x1   :  { %v12_v0 = vstv %s420_s6 }
   0x2   :  { %13 = vst [vmem:[#allocation2] sm:$0x1] %v12_v0 }
   0x3   :  { %14 = vsyncpa [#allocation4], 0  ;;  %s331_s26 = smov [#allocation3]   ;;  %s307_s30 = scalar_lea.hbm %s417_s3, 2048 }
   0x4   :  { %s26_s27 = sshll.u32 %s331_s26, 4  ;;  %p308_p0 = scmp.ne.s32.totalorder %s417_s3, %s307_s30  ;;  %s27_s27 = int_to_ptr.vmem [resolvable:$true] %s26_s27 }
   0x5   :  { %p311_p1 = scmp.lt.u32.totalorder %s307_s30, %s417_s3 }
   0x7   :  { %p313_p2 = pnand %p311_p1, %p308_p0 }
   0x9   :  { %316 = shalt.err (!%p313_p2)
}
   0xa   :  { %s317_s6 = scalar_lea.vmem %s27_s27, 2048  ;;  %p322_p4 = scmp.lt.s32.totalorder %s27_s27, %s27_s27 }
   0xb   :  { %p318_p3 = scmp.ne.s32.totalorder %s27_s27, %s317_s6  ;;  %p323_p5 = scmp.lt.s32.totalorder %s317_s6, %s317_s6 }
   0xd   :  { %p324_p6 = por %p323_p5, %p322_p4 }
   0xf   :  { %p325_p7 = pnand %p324_p6, %p318_p3 }
  0x11   :  { %328 = shalt.err (!%p325_p7)
}
  0x12   :  { %s332_s12 = smov 128   ;;  %s333_s13 = smov 8  }
  0x13   :  { %32 = dma.hbm_to_vmem [thread:$0]  %s417_s3, 2048, %s27_s27, [#allocation4], %s332_s12, %s332_s12, %s333_s13  }
  0x14   :  { %329 = dma.done.wait [#allocation4], 2048  }
  0x15   :  { %330 = vsyncadd [#allocation4], 4294965248  ;;  %v334_v1 = vmov 0   ;;  %v42_v2 = vld [vmem:[%s414_s0] sm:$0xff]  ;;  %v79_v4 = vld [vmem:[#allocation3 + $0x8] sm:$0xff]  ;;  %vm204_vm4 = vcmask 7168  }
  0x16   :  { %306 = vset.pattern.permute.xlu0 %v334_v1  ;;  %v78_v3 = vld [vmem:[#allocation3] sm:$0xff]  ;;  %v80_v5 = vld [vmem:[#allocation3 + $0x10] sm:$0xff]  ;;  %v81_v6 = vld [vmem:[#allocation3 + $0x18] sm:$0xff] }
  0x17   :  { %47 = vperm.xlu0 %306, %v42_v2   ;;  %v43_v7 = vld [vmem:[%s414_s0 + $0x8] sm:$0xff]  ;;  %v270_v8 = vpack.c.bf16 %v79_v4, %v78_v3  ;;  %v274_v9 = vpack.c.bf16 %v81_v6, %v80_v5  ;;  %v84_v13 = vld [vmem:[#allocation3 + $0x30] sm:$0xff]  ;;  %v85_v14 = vld [vmem:[#allocation3 + $0x38] sm:$0xff] }
  0x18   :  { %v82_v10 = vld [vmem:[#allocation3 + $0x20] sm:$0xff]  ;;  %v83_v11 = vld [vmem:[#allocation3 + $0x28] sm:$0xff]  ;;  %v282_v15 = vpack.c.bf16 %v85_v14, %v84_v13  ;;  %v88_v19 = vld [vmem:[#allocation3 + $0x50] sm:$0xff] }
  0x19   :  { %271 = vmatprep.subr.bf16.mxu0 %v270_v8  ;;  %v278_v12 = vpack.c.bf16 %v83_v11, %v82_v10  ;;  %v86_v16 = vld [vmem:[#allocation3 + $0x40] sm:$0xff]  ;;  %v87_v17 = vld [vmem:[#allocation3 + $0x48] sm:$0xff]  ;;  %v89_v20 = vld [vmem:[#allocation3 + $0x58] sm:$0xff] }
  0x1a   :  { %273 = vmatpush3.bf16.msra.mxu0 %v270_v8  ;;  %v286_v18 = vpack.c.bf16 %v87_v17, %v86_v16  ;;  %v290_v21 = vpack.c.bf16 %v89_v20, %v88_v19  ;;  %v90_v22 = vld [vmem:[#allocation3 + $0x60] sm:$0xff]  ;;  %v91_v23 = vld [vmem:[#allocation3 + $0x68] sm:$0xff]  ;;  %v92_v25 = vld [vmem:[#allocation3 + $0x70] sm:$0xff] }
  0x1b   :  { %52 = vperm.xlu0 %306, %v43_v7   ;;  %275 = vmatprep.subr.bf16.mxu0 %v274_v9  ;;  %v294_v24 = vpack.c.bf16 %v91_v23, %v90_v22  ;;  %v93_v26 = vld [vmem:[#allocation3 + $0x78] sm:$0xff] }
  0x1c   :  { %v298_v27 = vpack.c.bf16 %v93_v26, %v92_v25  ;;  %v212_v28 = vld [vmem:[%s415_s1] ss:$0 sm:$0xff] }
  0x1d   :  { %v213_v29 = vld [vmem:[%s416_s2] ss:$0 sm:$0xff] }
  0x1e   :  { %277 = vmatpush3.bf16.msra.mxu0 %v274_v9  ;;  %v214_v40 = vld [vmem:[%s418_s4] ss:$0 sm:$0xff] }
  0x1f   :  { %279 = vmatprep.subr.bf16.mxu0 %v278_v12  ;;  %v215_v45 = vld [vmem:[%s419_s5] ss:$0 sm:$0xff] }
  0x20   :  { %v216_v52 = vld [vmem:[#allocation2] ss:$0 sm:$0xff] }
  0x22   :  { %281 = vmatpush3.bf16.msra.mxu0 %v278_v12 }
  0x23   :  { %283 = vmatprep.subr.bf16.mxu0 %v282_v15 }
  0x26   :  { %285 = vmatpush3.bf16.msra.mxu0 %v282_v15 }
  0x27   :  { %287 = vmatprep.subr.bf16.mxu0 %v286_v18 }
  0x2a   :  { %289 = vmatpush3.bf16.msra.mxu0 %v286_v18 }
  0x2b   :  { %291 = vmatprep.subr.bf16.mxu0 %v290_v21 }
  0x2e   :  { %293 = vmatpush3.bf16.msra.mxu0 %v290_v21 }
  0x2f   :  { %295 = vmatprep.subr.bf16.mxu0 %v294_v24 }
  0x32   :  { %297 = vmatpush3.bf16.msra.mxu0 %v294_v24 }
  0x33   :  { %299 = vmatprep.subr.bf16.mxu0 %v298_v27 }
  0x36   :  { %301 = vmatpush3.bf16.msra.mxu0 %v298_v27 }
  0x96   :  { %v48_v30 = vpop.permute.xlu0 %47 }
  0x97   :  { %v61_v31 = vmul.f32 %v212_v28, %v48_v30 }
  0x99   :  { %v70_v32 = vadd.f32 %v213_v29, %v61_v31 }
  0x9a   :  { %v53_v33 = vpop.permute.xlu0 %52 }
  0x9b   :  { %v62_v34 = vmul.f32 %v212_v28, %v53_v33  ;;  %vm72_vm0 = vcmp.ge.f32.partialorder %v70_v32, 0.0  ;;  %v74_v35 = vmul.f32 0.2, %v70_v32 }
  0x9d   :  { %v71_v36 = vadd.f32 %v213_v29, %v62_v34  ;;  %v76_v37 = vsel %vm72_vm0, %v70_v32, %v74_v35 }
  0x9e   :  { %267 = vmatprep.mubr.f32.mxu0 %v76_v37 }
  0x9f   :  { %vm73_vm1 = vcmp.ge.f32.partialorder %v71_v36, 0.0  ;;  %v75_v38 = vmul.f32 0.2, %v71_v36 }
  0xa1   :  { %v77_v39 = vsel %vm73_vm1, %v71_v36, %v75_v38 }
  0xa2   :  { %268 = vmatmul.mubr.f32.vlgmr.msra.gmra.mrb[0].mxu0 %v77_v39 }
 0x175   :  { %v269_v41 = vpop.f32.mrb[0].mxu0 }
 0x176   :  { %v173_v42 = vadd.f32 %v269_v41, %v214_v40  ;;  %v167_v43 = vpop.f32.mrb[1].mxu0 }
 0x177   :  { %v168_v44 = vadd.f32 %v214_v40, %v167_v43 }
 0x178   :  { %v179_v46 = vmul.f32 0.2, %v173_v42  ;;  %vm177_vm3 = vcmp.ge.f32.partialorder %v173_v42, 0.0 }
 0x179   :  { %v178_v47 = vmul.f32 0.2, %v168_v44  ;;  %vm176_vm2 = vcmp.ge.f32.partialorder %v168_v44, 0.0 }
 0x17a   :  { %v181_v50 = vsel %vm177_vm3, %v173_v42, %v179_v46 }
 0x17b   :  { %v180_v48 = vsel %vm176_vm2, %v168_v44, %v178_v47  ;;  %v190_v51 = vmul.f32 %v215_v45, %v181_v50 }
 0x17c   :  { %v189_v49 = vmul.f32 %v215_v45, %v180_v48 }
 0x17e   :  { %191 = vadd.xlane.f32.xlu1 %v189_v49 }
 0x182   :  { %193 = vadd.xlane.f32.xlu1 %v190_v51 }
 0x20b   :  { %v192_v53 = vpop.xlane.xlu1 %191 }
 0x20c   :  { %v202_v54 = vadd.f32 %v216_v52, %v192_v53 }
 0x20e   :  { %205 = vst.msk [vmem:[%s421_s7] sm:$0xff] %vm204_vm4, %v202_v54 }
 0x20f   :  { %v194_v55 = vpop.xlane.xlu1 %193 }
 0x210   :  { %v203_v56 = vadd.f32 %v216_v52, %v194_v55 }
 0x212   :  { %206 = vst.msk [vmem:[%s421_s7 + $0x8] sm:$0xff] %vm204_vm4, %v203_v56 }
 0x213   :  { %211 = vsyncpa [#allocation4], 1 }

</bundles_post_ra>
